<compile_context>
chip_gen: v7x
topology: tpu7x:2x2x1
jax: 0.10.0
libtpu: 0.0.40
codegen_flags: <defaults>
</compile_context>

<pallas_src>
import math

import jax
import jax.numpy as jnp
from jax import lax
from jax.experimental import pallas as pl
from jax.experimental.pallas import tpu as pltpu


_SQRT_HALF = 1.0 / math.sqrt(2.0)


def _round_up(x, m):
    return (x + m - 1) // m * m


def _pick_gelu_chunk(tf):
    """Lane-aligned sub-chunk of the FFN slab used to interleave GELU with the matmuls."""
    if tf % 128 != 0:
        return tf
    chunk = 256 if tf % 256 == 0 else 128
    # Cap unrolling at ~16 chunks.
    while tf // chunk > 16 and tf % (chunk * 2) == 0:
        chunk *= 2
    return chunk


def _choose_ffn_tiling(ffn, max_tile):
    """Return (tf, ffn_padded).  tf divides ffn_padded; ffn_padded >= ffn."""
    if ffn <= max_tile:
        return ffn, ffn
    for cand in (2048, 1024, 512, 256, 128):
        if cand <= max_tile and ffn % cand == 0:
            return cand, ffn
    tf = max(128, (max_tile // 128) * 128)
    return tf, _round_up(ffn, tf)


def _vmem_capacity_bytes():
    try:
        return int(pltpu.get_tpu_info().vmem_capacity_bytes)
    except Exception:
        return 128 << 20  # v5e/v6e default


def _buffered_single_supported():
    try:
        pl.BlockSpec((8, 128), lambda i, f: (0, 0), pipeline_mode=pl.Buffered(1))
        return True
    except Exception:
        return False


def _make_ffn_kernel(tf, chunk):
    n_chunks = tf // chunk

    def kernel(x_ref, w1_ref, b1_ref, w2_ref, b2_ref, o_ref, acc_ref):
        # x_ref: (TM, H)  w1_ref: (H, TF)  b1_ref: (1, TF)  w2_ref: (TF, H)
        # b2_ref: (1, H)  o_ref: (TM, H)   acc_ref: (TM, H) f32 scratch
        f = pl.program_id(1)
        x = x_ref[...]

        # Process the FFN slab in lane-aligned sub-chunks: matmul1 -> GELU -> matmul2
        # per chunk.  Chunks are independent, so the MXU work of chunk c can overlap
        # the VALU/EUP erf-GELU of neighboring chunks, and the f32 intermediate stays
        # (TM, chunk) instead of (TM, TF).
        contrib = None
        for c in range(n_chunks):
            sl = slice(c * chunk, (c + 1) * chunk)
            h = jnp.dot(x, w1_ref[:, sl], preferred_element_type=jnp.float32)
            h = h + b1_ref[:, sl].astype(jnp.float32)
            # Exact GELU (nn.GELU() default): 0.5 * h * (1 + erf(h / sqrt(2))), in f32.
            h = 0.5 * h * (1.0 + lax.erf(h * _SQRT_HALF))
            d = jnp.dot(h.astype(w2_ref.dtype), w2_ref[sl, :],
                        preferred_element_type=jnp.float32)
            contrib = d if contrib is None else contrib + d

        # Direct write on the first slab (no zero-fill / RMW), accumulate afterwards.
        @pl.when(f == 0)
        def _():
            acc_ref[...] = contrib

        @pl.when(f > 0)
        def _():
            acc_ref[...] += contrib

        @pl.when(f == pl.num_programs(1) - 1)
        def _():
            o_ref[...] = (acc_ref[...] + b2_ref[...].astype(jnp.float32)).astype(o_ref.dtype)

    return kernel


def ffn_pallas(x, w1, b1, w2, b2, *, row_tile=512, ffn_tile=1024,
               use_bf16_matmul=False, _force_slab=False):
    """y = GELU(x @ w1 + b1) @ w2 + b2.

    x:  [..., hidden]
    w1: [hidden, ffn]   (pre-transposed, i.e. layer1.weight.T)
    b1: [ffn]
    w2: [ffn, hidden]   (pre-transposed, i.e. layer2.weight.T)
    b2: [hidden]
    """
    orig_shape = x.shape
    out_dtype = x.dtype
    hidden = orig_shape[-1]
    ffn = w1.shape[1]

    x2d = x.reshape(-1, hidden)
    rows = x2d.shape[0]

    if use_bf16_matmul and x2d.dtype == jnp.float32:
        # Optional v5e fast-MXU path: bf16 operands, f32 accumulation (intentional
        # mixed precision; off by default to preserve f32 numerics).
        x2d = x2d.astype(jnp.bfloat16)
        w1 = w1.astype(jnp.bfloat16)
        w2 = w2.astype(jnp.bfloat16)

    x_item = jnp.dtype(x2d.dtype).itemsize
    w_item = jnp.dtype(w1.dtype).itemsize
    sublane = max(8, 32 // x_item)          # 8 for f32, 16 for bf16, 32 for int8

    vmem_cap = _vmem_capacity_bytes()
    budget = max(vmem_cap - (16 << 20), vmem_cap // 2)   # headroom for internal scratch
    buffered_ok = _buffered_single_supported()

    def vmem_estimate(tm_, tf_, wbuf_):
        chunk_ = _pick_gelu_chunk(tf_)
        return (4 * tm_ * hidden * x_item                              # x + out tiles (double-buffered)
                + wbuf_ * (2 * hidden * tf_ + tf_ + hidden) * w_item   # W1/W2/b1/b2 buffers
                + tm_ * hidden * 4                                     # f32 accumulator
                + 2 * tm_ * chunk_ * 4)                                # live f32 GELU intermediates

    tm = min(row_tile, _round_up(rows, sublane))

    wbuf_res = 1 if buffered_ok else 2
    resident = (not _force_slab) and vmem_estimate(tm, ffn, wbuf_res) <= budget

    if resident:
        tf, ffn_pad, wbuf = ffn, ffn, wbuf_res
        # Ensure >= 2 row tiles so the "parallel" row axis can shard across both
        # TensorCores on v7x.  Free here: resident weights are not re-streamed.
        if rows > sublane and pl.cdiv(rows, tm) == 1:
            tm = _round_up(pl.cdiv(rows, 2), sublane)
    else:
        max_tf = ffn_tile if vmem_cap > (64 << 20) else min(ffn_tile, 512)
        tf, ffn_pad = _choose_ffn_tiling(ffn, max_tf)
        wbuf = 2
        # Shrink the row tile, then the FFN slab, until the working set fits.
        while vmem_estimate(tm, tf, wbuf) > budget and tm > 2 * sublane:
            tm = _round_up(tm // 2, sublane)
        while vmem_estimate(tm, tf, wbuf) > budget and tf % 256 == 0 and tf > 128:
            tf //= 2
            ffn_pad = _round_up(ffn, tf)

    # Host-side zero padding keeps FFN slabs lane-aligned.  GELU(0 @ x + 0) = 0, so the
    # padded h columns times the padded (zero) W2 rows contribute exactly 0 to the output.
    if ffn_pad != ffn:
        w1 = jnp.pad(w1, ((0, 0), (0, ffn_pad - ffn)))
        b1 = jnp.pad(b1, ((0, ffn_pad - ffn),))
        w2 = jnp.pad(w2, ((0, ffn_pad - ffn), (0, 0)))

    n_row = pl.cdiv(rows, tm)
    n_f = ffn_pad // tf
    chunk = _pick_gelu_chunk(tf)

    b1_2d = b1.reshape(1, ffn_pad)
    b2_2d = b2.reshape(1, hidden)

    single_buffer_weights = buffered_ok and n_f == 1

    def wspec(shape, imap):
        if single_buffer_weights:
            # Constant index map: DMA once, keep a single buffer (halves weight VMEM).
            return pl.BlockSpec(shape, imap, pipeline_mode=pl.Buffered(1))
        return pl.BlockSpec(shape, imap)

    vmem_est = vmem_estimate(tm, tf, 1 if single_buffer_weights else 2)
    vmem_limit = int(min(max(vmem_est * 5 // 4 + (2 << 20), 32 << 20),
                         vmem_cap - (8 << 20)))

    cost = pl.CostEstimate(
        flops=4 * rows * hidden * ffn,
        transcendentals=rows * ffn,
        bytes_accessed=(2 * rows * hidden) * x_item
        + (2 * hidden * ffn + ffn + hidden) * w_item,
    )

    out = pl.pallas_call(
        _make_ffn_kernel(tf, chunk),
        out_shape=jax.ShapeDtypeStruct((rows, hidden), out_dtype),
        grid_spec=pltpu.PrefetchScalarGridSpec(
            num_scalar_prefetch=0,
            grid=(n_row, n_f),
            in_specs=[
                pl.BlockSpec((tm, hidden), lambda i, f: (i, 0)),   # x row tile
                wspec((hidden, tf), lambda i, f: (0, f)),          # W1 slab
                wspec((1, tf), lambda i, f: (0, f)),               # b1 slab
                wspec((tf, hidden), lambda i, f: (f, 0)),          # W2 slab
                wspec((1, hidden), lambda i, f: (0, 0)),           # b2
            ],
            out_specs=pl.BlockSpec((tm, hidden), lambda i, f: (i, 0)),
            scratch_shapes=[pltpu.VMEM((tm, hidden), jnp.float32)],
        ),
        compiler_params=pltpu.CompilerParams(
            dimension_semantics=("parallel", "arbitrary"),
            vmem_limit_bytes=vmem_limit,
        ),
        cost_estimate=cost,
    )(x2d, w1, b1_2d, w2, b2_2d)

    return out.reshape(orig_shape)


def _ffn_reference(x, w1, b1, w2, b2):
    h = x @ w1 + b1
    h = 0.5 * h * (1.0 + lax.erf(h * _SQRT_HALF))
    return h @ w2 + b2


def init_ffn_params(key, hidden_size, ffn_size, dtype=jnp.float32):
    """Mimics nn.Linear default init (uniform +-1/sqrt(fan_in)); weights stored [in, out]."""
    k1, k2, k3, k4 = jax.random.split(key, 4)
    bound1 = 1.0 / math.sqrt(hidden_size)
    bound2 = 1.0 / math.sqrt(ffn_size)
    w1 = jax.random.uniform(k1, (hidden_size, ffn_size), dtype, -bound1, bound1)
    b1 = jax.random.uniform(k2, (ffn_size,), dtype, -bound1, bound1)
    w2 = jax.random.uniform(k3, (ffn_size, hidden_size), dtype, -bound2, bound2)
    b2 = jax.random.uniform(k4, (hidden_size,), dtype, -bound2, bound2)
    return w1, b1, w2, b2


if __name__ == "__main__":
    key = jax.random.PRNGKey(0)
    kx, kp, kx2, kp2, kx3, kp3 = jax.random.split(key, 6)

    # --- small shapes implied by the module: resident fast path (+ 2 row tiles) ---
    batch, seq, hidden, ffn = 2, 8, 32, 64
    x = jax.random.normal(kx, (batch, seq, hidden), dtype=jnp.float32)
    w1, b1, w2, b2 = init_ffn_params(kp, hidden, ffn)

    y = jax.block_until_ready(ffn_pallas(x, w1, b1, w2, b2))
    y_ref = _ffn_reference(x, w1, b1, w2, b2)
    assert y.shape == (batch, seq, hidden)
    assert jnp.allclose(y, y_ref, atol=1e-5, rtol=1e-5)

    # --- slabbed path: FFN-slab streaming + accumulation across slabs & row tiles ---
    batch2, seq2, hidden2, ffn2 = 2, 128, 128, 256
    x2 = jax.random.normal(kx2, (batch2, seq2, hidden2), dtype=jnp.float32)
    w1b, b1b, w2b, b2b = init_ffn_params(kp2, hidden2, ffn2)
    y2 = jax.block_until_ready(
        ffn_pallas(x2, w1b, b1b, w2b, b2b, row_tile=128, ffn_tile=128, _force_slab=True))
    y2_ref = _ffn_reference(x2, w1b, b1b, w2b, b2b)
    assert jnp.allclose(y2, y2_ref, atol=1e-4, rtol=1e-4)

    # --- slabbed path with awkward FFN size (zero-padded to a 128-multiple) + ragged rows ---
    batch3, seq3, hidden3, ffn3 = 2, 9, 128, 192
    x3 = jax.random.normal(kx3, (batch3, seq3, hidden3), dtype=jnp.float32)
    w1c, b1c, w2c, b2c = init_ffn_params(kp3, hidden3, ffn3)
    y3 = jax.block_until_ready(
        ffn_pallas(x3, w1c, b1c, w2c, b2c, row_tile=64, ffn_tile=128, _force_slab=True))
    y3_ref = _ffn_reference(x3, w1c, b1c, w2c, b2c)
    assert jnp.allclose(y3, y3_ref, atol=1e-4, rtol=1e-4)

    print("KERNEL_OK")
</pallas_src>

<mosaic_0001>
module attributes {stable_mosaic.version = 11 : i64} {
  func.func @kernel(%arg0: i32, %arg1: i32, %arg2: memref<8x32xf32, #tpu.memory_space<vmem>>, %arg3: memref<32x64xf32, #tpu.memory_space<vmem>>, %arg4: memref<1x64xf32, #tpu.memory_space<vmem>>, %arg5: memref<64x32xf32, #tpu.memory_space<vmem>>, %arg6: memref<1x32xf32, #tpu.memory_space<vmem>>, %arg7: memref<8x32xf32, #tpu.memory_space<vmem>>, %arg8: memref<8x32xf32, #tpu.memory_space<vmem>>) attributes {dimension_semantics = [#tpu.dimension_semantics<parallel>, #tpu.dimension_semantics<arbitrary>], iteration_bounds = array<i64: 2, 1>, scalar_prefetch = 0 : i64, scratch_operands = 1 : i64, tpu.core_type = #tpu.core_type<tc>, window_params = [{transform_indices = @transform_0, window_bounds = array<i64: 8, 32>}, {pipeline_mode = #tpu.pipeline_mode<synchronous>, transform_indices = @transform_1, window_bounds = array<i64: 32, 64>}, {pipeline_mode = #tpu.pipeline_mode<synchronous>, transform_indices = @transform_2, window_bounds = array<i64: 1, 64>}, {pipeline_mode = #tpu.pipeline_mode<synchronous>, transform_indices = @transform_3, window_bounds = array<i64: 64, 32>}, {pipeline_mode = #tpu.pipeline_mode<synchronous>, transform_indices = @transform_4, window_bounds = array<i64: 1, 32>}, {transform_indices = @transform_5, window_bounds = array<i64: 8, 32>}]} {
    %c0 = arith.constant 0 : index
    %c0_0 = arith.constant 0 : index
    %0 = vector.load %arg2[%c0, %c0_0] : memref<8x32xf32, #tpu.memory_space<vmem>>, vector<8x32xf32>
    %c0_1 = arith.constant 0 : index
    %c0_2 = arith.constant 0 : index
    %1 = vector.load %arg3[%c0_1, %c0_2] : memref<32x64xf32, #tpu.memory_space<vmem>>, vector<32x64xf32>
    %cst = arith.constant dense<0.000000e+00> : vector<8x64xf32>
    %2 = tpu.matmul %0, %1, %cst {dimension_numbers = #tpu.dot_dimension_numbers<[1], [0], [0], [1], [0, 0, 1, 1], [], []>} : vector<8x32xf32>, vector<32x64xf32>, vector<8x64xf32> -> vector<8x64xf32>
    %c0_3 = arith.constant 0 : index
    %c0_4 = arith.constant 0 : index
    %3 = vector.load %arg4[%c0_3, %c0_4] : memref<1x64xf32, #tpu.memory_space<vmem>>, vector<1x64xf32>
    %4 = vector.broadcast %3 : vector<1x64xf32> to vector<8x64xf32>
    %5 = arith.addf %2, %4 : vector<8x64xf32>
    %cst_5 = arith.constant 5.000000e-01 : f32
    %6 = vector.broadcast %cst_5 : f32 to vector<8x64xf32>
    %7 = arith.mulf %6, %5 : vector<8x64xf32>
    %cst_6 = arith.constant 0.707106769 : f32
    %8 = vector.broadcast %cst_6 : f32 to vector<8x64xf32>
    %9 = arith.mulf %5, %8 : vector<8x64xf32>
    %10 = math.erf %9 : vector<8x64xf32>
    %cst_7 = arith.constant 1.000000e+00 : f32
    %11 = vector.broadcast %cst_7 : f32 to vector<8x64xf32>
    %12 = arith.addf %11, %10 : vector<8x64xf32>
    %13 = arith.mulf %7, %12 : vector<8x64xf32>
    %c0_8 = arith.constant 0 : index
    %c0_9 = arith.constant 0 : index
    %14 = vector.load %arg5[%c0_8, %c0_9] : memref<64x32xf32, #tpu.memory_space<vmem>>, vector<64x32xf32>
    %cst_10 = arith.constant dense<0.000000e+00> : vector<8x32xf32>
    %15 = tpu.matmul %13, %14, %cst_10 {dimension_numbers = #tpu.dot_dimension_numbers<[1], [0], [0], [1], [0, 0, 1, 1], [], []>} : vector<8x64xf32>, vector<64x32xf32>, vector<8x32xf32> -> vector<8x32xf32>
    %c0_i32 = arith.constant 0 : i32
    %16 = arith.cmpi eq, %arg1, %c0_i32 : i32
    %17 = arith.extui %16 : i1 to i32
    %c0_i32_11 = arith.constant 0 : i32
    %18 = arith.cmpi ne, %17, %c0_i32_11 : i32
    scf.if %18 {
      %c0_16 = arith.constant 0 : index
      %c0_17 = arith.constant 0 : index
      %25 = vector.load %arg8[%c0_16, %c0_17] : memref<8x32xf32, #tpu.memory_space<vmem>>, vector<8x32xf32>
      tpu.vector_store %arg8[%c0_16, %c0_17], %15 {strides = array<i32>} : memref<8x32xf32, #tpu.memory_space<vmem>>, vector<8x32xf32>,
    } else {
    }
    %c0_i32_12 = arith.constant 0 : i32
    %19 = arith.cmpi sgt, %arg1, %c0_i32_12 : i32
    %20 = arith.extui %19 : i1 to i32
    %c0_i32_13 = arith.constant 0 : i32
    %21 = arith.cmpi ne, %20, %c0_i32_13 : i32
    scf.if %21 {
      %c0_16 = arith.constant 0 : index
      %c0_17 = arith.constant 0 : index
      %25 = vector.load %arg8[%c0_16, %c0_17] : memref<8x32xf32, #tpu.memory_space<vmem>>, vector<8x32xf32>
      %26 = arith.addf %25, %15 : vector<8x32xf32>
      %c0_18 = arith.constant 0 : index
      %c0_19 = arith.constant 0 : index
      %27 = vector.load %arg8[%c0_18, %c0_19] : memref<8x32xf32, #tpu.memory_space<vmem>>, vector<8x32xf32>
      tpu.vector_store %arg8[%c0_18, %c0_19], %26 {strides = array<i32>} : memref<8x32xf32, #tpu.memory_space<vmem>>, vector<8x32xf32>,
    } else {
    }
    %c0_i32_14 = arith.constant 0 : i32
    %22 = arith.cmpi eq, %arg1, %c0_i32_14 : i32
    %23 = arith.extui %22 : i1 to i32
    %c0_i32_15 = arith.constant 0 : i32
    %24 = arith.cmpi ne, %23, %c0_i32_15 : i32
    scf.if %24 {
      %c0_16 = arith.constant 0 : index
      %c0_17 = arith.constant 0 : index
      %25 = vector.load %arg8[%c0_16, %c0_17] : memref<8x32xf32, #tpu.memory_space<vmem>>, vector<8x32xf32>
      %c0_18 = arith.constant 0 : index
      %c0_19 = arith.constant 0 : index
      %26 = vector.load %arg6[%c0_18, %c0_19] : memref<1x32xf32, #tpu.memory_space<vmem>>, vector<1x32xf32>
      %27 = vector.broadcast %26 : vector<1x32xf32> to vector<8x32xf32>
      %28 = arith.addf %25, %27 : vector<8x32xf32>
      %c0_20 = arith.constant 0 : index
      %c0_21 = arith.constant 0 : index
      %29 = vector.load %arg7[%c0_20, %c0_21] : memref<8x32xf32, #tpu.memory_space<vmem>>, vector<8x32xf32>
      tpu.vector_store %arg7[%c0_20, %c0_21], %28 {strides = array<i32>} : memref<8x32xf32, #tpu.memory_space<vmem>>, vector<8x32xf32>,
    } else {
    }
    return
  }
  func.func @transform_0(%arg0: i32, %arg1: i32) -> (i32, i32) {
    %c0_i32 = arith.constant 0 : i32
    %c0_i32_0 = arith.constant 0 : i32
    return %arg0, %c0_i32 : i32, i32
  }
  func.func @transform_1(%arg0: i32, %arg1: i32) -> (i32, i32) {
    %c0_i32 = arith.constant 0 : i32
    %c0_i32_0 = arith.constant 0 : i32
    return %c0_i32, %arg1 : i32, i32
  }
  func.func @transform_2(%arg0: i32, %arg1: i32) -> (i32, i32) {
    %c0_i32 = arith.constant 0 : i32
    %c0_i32_0 = arith.constant 0 : i32
    return %c0_i32, %arg1 : i32, i32
  }
  func.func @transform_3(%arg0: i32, %arg1: i32) -> (i32, i32) {
    %c0_i32 = arith.constant 0 : i32
    %c0_i32_0 = arith.constant 0 : i32
    return %arg1, %c0_i32 : i32, i32
  }
  func.func @transform_4(%arg0: i32, %arg1: i32) -> (i32, i32) {
    %c0_i32 = arith.constant 0 : i32
    %c0_i32_0 = arith.constant 0 : i32
    %c0_i32_1 = arith.constant 0 : i32
    return %c0_i32, %c0_i32_0 : i32, i32
  }
  func.func @transform_5(%arg0: i32, %arg1: i32) -> (i32, i32) {
    %c0_i32 = arith.constant 0 : i32
    %c0_i32_0 = arith.constant 0 : i32
    return %arg0, %c0_i32 : i32, i32
  }
}

</mosaic_0001>

<bundles_post_ra>
// kernel: tpu_custom_call.1
= control target key start
LH: loop header
LB: loop body
LE: loop exit
PB: predicated region body
PF: predicated region fallthrough
CT: control target
= control target key end

     0   :  { %10 = vsyncpa [#allocation4], 0  ;;  %s1017_s0 = inlined_call_operand.vmem [shape: f32[16,32], index: 0, kind: input, shape index: {}]   ;;  %s1018_s1 = inlined_call_operand.vmem [shape: f32[32,64], index: 1, kind: input, shape index: {}]   ;;  %s1019_s2 = inlined_call_operand.vmem [shape: f32[1,64], index: 2, kind: input, shape index: {}]   ;;  %s1020_s3 = inlined_call_operand.vmem [shape: f32[64,32], index: 3, kind: input, shape index: {}]   ;;  %s1021_s4 = inlined_call_operand.vmem [shape: f32[1,32], index: 4, kind: input, shape index: {}]   ;;  %s1022_s5 = inlined_call_operand.hbm [shape: f32[16,32], index: 5, kind: output, shape index: {}]  }
   0x1   :  { %12 = vsyncpa [#allocation4 + $0x1], 0  ;;  %s860_s18 = smov 0   ;;  %s862_s19 = smov 0  }
   0x2   :  { %s864_s20 = smov 0   ;;  %s866_s21 = smov 0  }
   0x3   :  { %s868_s22 = smov 0   ;;  %s870_s23 = smov 0  }
   0x4 LB: > { %s606_s24 = sadd.s32 4294967295, %s824_s23   ;;  %s607_s25 = sadd.s32 4294967294, %s824_s23   ;;  %s824_s23 = sphi %s870_s23, %s18_s23   ;;  %s820_s22 = sphi %s868_s22, %s1029_s22   ;;  %s816_s21 = sphi %s866_s21, %s1028_s21   ;;  %s812_s20 = sphi %s864_s20, %s1027_s20   ;;  %s808_s19 = sphi %s862_s19, %s1026_s19   ;;  %s804_s18 = sphi %s860_s18, %s1025_s18  }
   0x5   : > { %s30_s26 = sadd.s32 1, %s820_s22  ;;  %s162_s27 = sadd.s32 1, %s812_s20 }
   0x6   : > { %p32_p0 = scmp.ge.s32.totalorder %s30_s26, 2  ;;  %p172_p1 = scmp.ne.s32.totalorder %s812_s20, %s808_s19 }
   0x7   : > { %p173_p2 = scmp.eq.s32.totalorder %s606_s24, 1  ;;  %p178_p3 = scmp.ne.s32.totalorder %s808_s19, %s804_s18 }
   0x8   : > { %s1031_s26 = smov (%p32_p0, %s30_s26), 0  ;;  %p179_p5 = scmp.eq.s32.totalorder %s607_s25, 1 }
   0x9   : > { %p900_p4 = por %p173_p2, %p172_p1  ;;  %s159_s29 = ssub.s32 %s820_s22, %s1031_s26 }
   0xa   : > { %p613_p6 = scmp.ge.s32.totalorder %s824_s23, 1  ;;  %p160_p7 = scmp.eq.s32.totalorder %s159_s29, 0 }
   0xb   : > { %p907_p8 = por %p179_p5, %p178_p3  ;;  %p229_p9 = scmp.lt.s32.totalorder %s824_s23, 3 }
   0xc   : > { %s913_s6 = scalar_select %p160_p7, %s812_s20, %s162_s27  }
   0xd   : > { %p230_p10 = pnand %p613_p6, %p229_p9 }
   0xe   : > { %v286_v0 = vld [vmem:[%s1018_s1] sm:$0xff] (!%p230_p10)  ;;  %v287_v1 = vld [vmem:[%s1018_s1 + $0x8] sm:$0xff] (!%p230_p10)  ;;  %v288_v2 = vld [vmem:[%s1018_s1 + $0x10] sm:$0xff] (!%p230_p10)  ;;  %v826_v3 = vmov (!%p230_p10), 0.0|0.0   ;;  %vm827_vm0 = vmmov (!%p230_p10), 0   ;;  %v828_v6 = vmov (!%p230_p10), 0.0  }
   0xf   : > { %233 = sbr.rel (%p230_p10) target bundleno = 494 (0x1ee), region = 40  ;;  %668 = vmatprep.subr.bf16.mxu0 (!%p230_p10), %v826_v3  ;;  %v669_v4 = vpack.c.bf16 (!%p230_p10), %v287_v1, %v286_v0  ;;  %v289_v5 = vld [vmem:[%s1018_s1 + $0x18] sm:$0xff] (!%p230_p10)  ;;  %646 = vmatprep.mubr.msk.f32.mxu0 (!%p230_p10), %vm827_vm0, %v828_v6  ;;  %p268_p11 = scmp.lt.s32.totalorder (!%p230_p10), %s816_s21, 1  ;;  %vm297_vm1 = vcmask (!%p230_p10), 261120   ;;  %v376_v9 = vld [vmem:[%s1020_s3] sm:$0xff] (!%p230_p10)  ;;  %v377_v10 = vld [vmem:[%s1020_s3 + $0x8] sm:$0xff] (!%p230_p10) }
  0x10   : > { %674 = vmatprep.subr.bf16.mxu1 (!%p230_p10), %v826_v3  ;;  %665 = vmatprep.mubr.msk.f32.mxu1 (!%p230_p10), %vm827_vm0, %v828_v6  ;;  %v672_v7 = vpack.c.bf16 (!%p230_p10), %v289_v5, %v288_v2  ;;  %v675_v11 = vpack.c.bf16 (!%p230_p10), %v377_v10, %v376_v9  ;;  %v378_v12 = vld [vmem:[%s1020_s3 + $0x10] sm:$0xff] (!%p230_p10)  ;;  %v379_v13 = vld [vmem:[%s1020_s3 + $0x18] sm:$0xff] (!%p230_p10)  ;;  %v380_v15 = vld [vmem:[%s1020_s3 + $0x20] sm:$0xff] (!%p230_p10)  ;;  %vm384_vm2 = vcmask (!%p230_p10), 523264   ;;  %s265_s8 = sand.u32 (!%p230_p10), 1, %s808_s19   ;;  %s621_s12 = sshll.u32 (!%p230_p10), %s816_s21, 7 }
  0x11   : > { %670 = vmatpush3.bf16.msra.mxu0 (!%p230_p10), %v669_v4  ;;  %v678_v14 = vpack.c.bf16 (!%p230_p10), %v379_v13, %v378_v12  ;;  %v381_v16 = vld [vmem:[%s1020_s3 + $0x28] sm:$0xff] (!%p230_p10)  ;;  %v382_v18 = vld [vmem:[%s1020_s3 + $0x30] sm:$0xff] (!%p230_p10)  ;;  %v383_v19 = vld [vmem:[%s1020_s3 + $0x38] sm:$0xff] (!%p230_p10)  ;;  %s614_s9 = sshll.u32 (!%p230_p10), %s265_s8, 3  ;;  %s969_s17 = scalar_lea.hbm (!%p230_p10), %s1022_s5, %s621_s12 }
  0x12   : > { %671 = vmatprep.subr.bf16.mxu0 (!%p230_p10), %v826_v3  ;;  %676 = vmatpush3.bf16.msra.mxu1 (!%p230_p10), %v675_v11  ;;  %v681_v17 = vpack.c.bf16 (!%p230_p10), %v381_v16, %v380_v15  ;;  %v684_v20 = vpack.c.bf16 (!%p230_p10), %v383_v19, %v382_v18  ;;  %v616_v21 = vld [vmem:[%s1019_s2] ss:$0 sm:$0xff] (!%p230_p10)  ;;  %s267_s13 = scalar_lea.vmem (!%p230_p10), [#allocation3], %s614_s9  ;;  %s484_s24 = scalar_lea.sflag (!%p230_p10), [#allocation4], %s265_s8 }
  0x13   : > { %677 = vmatprep.subr.bf16.mxu1 (!%p230_p10), %v826_v3  ;;  %v619_v32 = vld [vmem:[%s1021_s4] ss:$0 sm:$0xff] (!%p230_p10)  ;;  %s497_s14 = sshll.u32 (!%p230_p10), %s267_s13, 4  ;;  %s971_s14 = int_to_ptr.vmem [resolvable:$true] %s497_s14 }
  0x15   : > { %673 = vmatpush3.bf16.msra.mxu0 (!%p230_p10), %v672_v7 }
  0x16   : > { %s269_s15 = scalar_select %p268_p11, %s816_s21, 1  ;;  %679 = vmatpush3.bf16.msra.mxu1 %v678_v14 }
  0x17   : > { %680 = vmatprep.subr.bf16.mxu1 %v826_v3  ;;  %s829_s21 = smov [#allocation3]  }
  0x18   : > { %s615_s16 = sshll.u32 %s269_s15, 3  ;;  %s750_s27 = sshll.u32 %s829_s21, 4  ;;  %s751_s27 = int_to_ptr.vmem [resolvable:$false] %s750_s27 }
  0x19   : > { %s271_s25 = scalar_lea.vmem %s1017_s0, %s615_s16  ;;  %s752_s29 = scalar_lea.vmem %s751_s27, 256 }
  0x1a   : > { %v285_v8 = vld [vmem:[%s271_s25] sm:$0xff]  ;;  %682 = vmatpush3.bf16.msra.mxu1 %v681_v17  ;;  %s746_s25 = scalar_lea.vmem %s971_s14, 128  ;;  %p753_p1 = scmp.lt.s32.totalorder %s971_s14, %s751_s27 }
  0x1b   : > { %647 = vmatmul.mubr.msk.f32.vlgmr.msra.gmra.mrb[0].mxu0 %vm297_vm1, %v285_v8  ;;  %683 = vmatprep.subr.bf16.mxu1 %v826_v3  ;;  %p747_p12 = scmp.ne.s32.totalorder %s971_s14, %s746_s25  ;;  %p754_p2 = scmp.lt.s32.totalorder %s752_s29, %s746_s25 }
  0x1d   : > { %p748_p13 = pnand %p747_p12, %p900_p4  ;;  %p755_p3 = por %p754_p2, %p753_p1 }
  0x1e   : > { %685 = vmatpush3.bf16.msra.mxu1 %v684_v20 }
  0x1f   : > { %p749_p0 = pneg %p748_p13 }
  0x21   : > { %p756_p5 = pnand %p755_p3, %p749_p0 }
  0xee   : > { %v367_v22 = vpop.f32.mrb[0].mxu0 }
  0xef   : > { %v368_v23 = vadd.f32 %v616_v21, %v367_v22  ;;  %v648_v24 = vpop.f32.mrb[1].mxu0 }
  0xf1   : > { %v372_v25 = vmul.f32 0.70710677, %v368_v23  ;;  %v371_v27 = vmul.f32 0.5, %v368_v23 }
  0xf3   : > { %744 = verf.f32 %v372_v25 }
  0xfd   : > { %v745_v26 = vpop.eup %744 }
  0xfe   : > { %v374_v28 = vadd.f32 1.0, %v745_v26 }
 0x100   : > { %v375_v29 = vmul.f32 %v374_v28, %v371_v27 }
 0x102   : > { %666 = vmatmul.mubr.msk.f32.vlgmr.msra.gmra.mrb[0].mxu1 %vm384_vm2, %v375_v29 }
 0x1d5   : > { %v454_v30 = vpop.f32.mrb[0].mxu1 }
 0x1d6   : > { %462 = vst.msk [vmem:[#allocation2] sm:$0xff] %vm297_vm1, %v454_v30  ;;  %v667_v31 = vpop.f32.mrb[1].mxu1 }
 0x1dd   : > { %v473_v33 = vld [vmem:[#allocation2] sm:$0xff] }
 0x1de   : > { %v481_v34 = vadd.f32 %v619_v32, %v473_v33 }
 0x1e0   : > { %482 = vst.msk [vmem:[%s267_s13] sm:$0xff] %vm297_vm1, %v481_v34 }
 0x1e1   : > { %759 = shalt.err (!%p756_p5)
}
 0x1e2   : > { %s760_s7 = scalar_lea.hbm %s969_s17, 128  ;;  %s764_s10 = scalar_lea.hbm %s1022_s5, 256 }
 0x1e3   : > { %p761_p6 = scmp.ne.s32.totalorder %s969_s17, %s760_s7  ;;  %p765_p10 = scmp.lt.u32.totalorder %s969_s17, %s1022_s5 }
 0x1e4   : > { %p766_p11 = scmp.lt.u32.totalorder %s764_s10, %s760_s7  ;;  %p768_p13 = scmp.lt.u32.totalorder %s760_s7, %s969_s17 }
 0x1e5   : > { %p762_p7 = pnand %p761_p6, %p900_p4 }
 0x1e6   : > { %p767_p12 = por %p766_p11, %p765_p10 }
 0x1e7   : > { %p763_p9 = pneg %p762_p7 }
 0x1e8   : > { %p769_p0 = por %p768_p13, %p767_p12 }
 0x1ea   : > { %p770_p1 = pnand %p769_p0, %p763_p9 }
 0x1ec   : > { %773 = shalt.err (!%p770_p1)
}
 0x1ed   : > { %686 = dma.vmem_to_hbm [thread:$0]  (%p900_p4), %s971_s14, 128, %s969_s17, %s484_s24  }
 0x1ee PF: > { %p692_p2 = scmp.ge.s32.totalorder %s824_s23, 2  ;;  %s509_s13 = sand.u32 1, %s804_s18  }
 0x1ef   : > { %s510_s15 = scalar_lea.sflag [#allocation4], %s509_s13 }
 0x1f0   : > { %p689_p3 = pnand %p692_p2, %p907_p8 }
 0x1f2   : > { %799 = dma.done.wait (!%p689_p3), %s510_s15, 128  }
 0x1f3   : > { %801 = vsyncadd (!%p689_p3), %s510_s15, 4294967168  ;;  %s18_s23 = sadd.s32 1, %s824_s23   ;;  %s1025_s18 = smov %s808_s19 }
 0x1f4   : > { %p15_p5 = scmp.ge.s32.totalorder %s18_s23, 4   ;;  %s1026_s19 = smov %s812_s20 }
 0x1f5   : > { %s1027_s20 = smov %s913_s6  ;;  %s1028_s21 = smov %s820_s22 }
 0x1f6   : > { %s1029_s22 = smov %s1031_s26  ;;  %17 = sbr.rel (!%p15_p5) target bundleno = 4 (0x4), region = 96 }
 0x1fd   :  { %515 = vsyncpa [#allocation4], 1 }
 0x1fe   :  { %517 = vsyncpa [#allocation4 + $0x1], 1 }

</bundles_post_ra>
